<compile_context>
chip_gen: v5e
topology: v5e:2x2
jax: 0.10.0
libtpu: 0.0.40
codegen_flags: <defaults>
</compile_context>

<pallas_src>
import functools
import math

import jax
import jax.numpy as jnp
from jax.experimental import pallas as pl
from jax.experimental.pallas import tpu as pltpu


# ---------------------------------------------------------------------------
# Parameter setup (PositionalEncoding.__init__): pe buffer, shape (max_len, 1, D).
# ---------------------------------------------------------------------------
def make_positional_encoding(d_model: int, max_len: int = 5000) -> jnp.ndarray:
    position = jnp.arange(0, max_len, dtype=jnp.float32)[:, None]            # (max_len, 1)
    div_term = jnp.exp(
        jnp.arange(0, d_model, 2, dtype=jnp.float32) * (-math.log(10000.0) / d_model)
    )                                                                         # (d_model/2,)
    angles = position * div_term                                              # (max_len, d_model/2)
    pe = jnp.zeros((max_len, d_model), dtype=jnp.float32)
    pe = pe.at[:, 0::2].set(jnp.sin(angles))
    pe = pe.at[:, 1::2].set(jnp.cos(angles))
    return pe[:, None, :]   # unsqueeze(0).transpose(0, 1) -> (max_len, 1, d_model)


# ---------------------------------------------------------------------------
# Kernels (pure memory-bound broadcast adds; f32 accumulate, cast on store).
# ---------------------------------------------------------------------------
def _pe_add_3d_kernel(x_ref, pe_ref, o_ref):
    # x: (ts, B, D); pe: (ts, 1, D) -> broadcast over batch (sublane) on the VPU.
    o_ref[...] = (x_ref[...].astype(jnp.float32) + pe_ref[...]).astype(o_ref.dtype)


def _pe_add_2d_kernel(x_ref, pe_ref, o_ref, *, batch):
    # x: (ts, B*D); pe: (ts, D) -> replicate over batch inside VMEM only
    # (jnp.tile is the supported replacement for pltpu.repeat); no HBM traffic.
    pe_b = jnp.tile(pe_ref[...], (1, batch))                    # (ts, B*D), f32
    o_ref[...] = (x_ref[...].astype(jnp.float32) + pe_b).astype(o_ref.dtype)


# ---------------------------------------------------------------------------
# Tiling helpers.
# ---------------------------------------------------------------------------
def _dtype_sublane(dtype) -> int:
    # Packing sublane multiple: 8 for f32, 16 for bf16, 32 for int8/fp8.
    return max(8, 32 // jnp.dtype(dtype).itemsize)


def _default_vmem_limit_bytes() -> int:
    try:
        cap = pltpu.get_tpu_info().vmem_capacity_bytes
    except Exception:
        cap = 64 * 1024 * 1024
    # ~3/4 of physical VMEM: ~96 MiB on v5e/v6e (128 MiB), ~48 MiB on v7x (64 MiB).
    return min((cap * 3) // 4, 96 * 1024 * 1024)


def _choose_tile_rows(seq_len: int, bytes_per_row: int, budget_bytes: int, sublane: int) -> int:
    """Seq-rows per block. Always a multiple of `sublane` (>=8) or == seq_len, so
    the 2-D path's second-to-last block dim never violates the (8,128) rule."""
    def round_up(v, m):
        return ((v + m - 1) // m) * m

    max_rows = max(1, budget_bytes // max(1, bytes_per_row))
    if max_rows >= seq_len:
        # Whole sequence fits one block: still split into >=2 grid steps so both
        # v7x TensorCores get work (neutral on single-core v5e/v6e).
        if seq_len <= sublane:
            return seq_len
        ts = round_up(pl.cdiv(seq_len, 2), sublane)
        return ts if ts < seq_len else seq_len
    ts = (max_rows // sublane) * sublane
    if ts == 0:
        # Budget smaller than one sublane-aligned row-group: clamp up (never emit
        # a second-to-last block dim that is neither %8 nor the full extent).
        ts = min(sublane, seq_len)
    return ts


# ---------------------------------------------------------------------------
# Forward pass.
# ---------------------------------------------------------------------------
def positional_encoding_forward(
    x: jnp.ndarray,
    pe_full: jnp.ndarray,
    *,
    block_budget_bytes: int = None,
    vmem_limit_bytes: int = None,
    donate_x: bool = True,
) -> jnp.ndarray:
    """x: (seq_len, batch, d_model); pe_full: (max_len, 1, d_model)."""
    seq_len, batch, d_model = x.shape
    assert pe_full.shape[0] >= seq_len and pe_full.shape[-1] == d_model

    # Torch-style dtype promotion (bf16 x + f32 pe -> f32 result); add in f32.
    out_dtype = jnp.promote_types(x.dtype, pe_full.dtype)
    pe_f32 = pe_full[:seq_len].astype(jnp.float32)              # (S, 1, D), tiny

    if vmem_limit_bytes is None:
        vmem_limit_bytes = _default_vmem_limit_bytes()
    if block_budget_bytes is None:
        block_budget_bytes = max(2 << 20, vmem_limit_bytes - (4 << 20))

    # Bytes of all double-buffered blocks per seq row: 2x(x + out) + 2x pe.
    row = batch * d_model
    bytes_per_row = 2 * (
        row * jnp.dtype(x.dtype).itemsize
        + row * jnp.dtype(out_dtype).itemsize
        + d_model * 4
    )
    sublane = _dtype_sublane(x.dtype)
    ts = _choose_tile_rows(seq_len, bytes_per_row, block_budget_bytes, sublane)
    grid = (pl.cdiv(seq_len, ts),)

    if d_model % 128 == 0:
        # 3-D path: D is a lane multiple -> unmasked lane-dense stores, natural
        # batch broadcast from the (ts, 1, D) pe block.
        kernel = _pe_add_3d_kernel
        args = (x, pe_f32)
        in_specs = [
            pl.BlockSpec((ts, batch, d_model), lambda i: (i, 0, 0)),
            pl.BlockSpec((ts, 1, d_model), lambda i: (i, 0, 0)),
        ]
        out_specs = pl.BlockSpec((ts, batch, d_model), lambda i: (i, 0, 0))
        out_shape = jax.ShapeDtypeStruct((seq_len, batch, d_model), out_dtype)
        unflatten = lambda o: o
    else:
        # 2-D lane-collapsed path: x -> (S, B*D) (metadata-only reshape in XLA),
        # pe stays (S, D); replicate over batch on-chip (no HBM tiling of pe).
        kernel = functools.partial(_pe_add_2d_kernel, batch=batch)
        args = (x.reshape(seq_len, row), pe_f32.reshape(seq_len, d_model))
        in_specs = [
            pl.BlockSpec((ts, row), lambda i: (i, 0)),
            pl.BlockSpec((ts, d_model), lambda i: (i, 0)),
        ]
        out_specs = pl.BlockSpec((ts, row), lambda i: (i, 0))
        out_shape = jax.ShapeDtypeStruct((seq_len, row), out_dtype)
        unflatten = lambda o: o.reshape(seq_len, batch, d_model)

    # In-place friendly when dtypes allow it (does not change bytes moved).
    io_aliases = {0: 0} if (donate_x and x.dtype == out_dtype) else {}

    out = pl.pallas_call(
        kernel,
        out_shape=out_shape,
        grid_spec=pl.GridSpec(grid=grid, in_specs=in_specs, out_specs=out_specs),
        compiler_params=pltpu.CompilerParams(
            dimension_semantics=("parallel",),
            vmem_limit_bytes=int(vmem_limit_bytes),
        ),
        input_output_aliases=io_aliases,
    )(*args)
    return unflatten(out)


if __name__ == "__main__":
    key = jax.random.PRNGKey(0)
    k1, k2 = jax.random.split(key)
    max_len = 64   # keep the synthetic buffer small (module default is 5000)

    # ----- Case 1: d_model < 128 -> 2-D lane-collapsed path ------------------
    d_model, seq_len, batch = 32, 32, 2
    pe_full = make_positional_encoding(d_model, max_len)
    x = jax.random.normal(k1, (seq_len, batch, d_model), dtype=jnp.float32)
    ref = x + pe_full[:seq_len]

    out = jax.block_until_ready(positional_encoding_forward(x, pe_full))
    assert out.shape == ref.shape and out.dtype == ref.dtype
    assert jnp.allclose(out, ref, atol=1e-6), "mismatch vs reference (2-D path)"

    # Force a small block budget -> ts = 8 rows, 4 grid steps (pipelined path).
    out_tiled = jax.block_until_ready(
        positional_encoding_forward(x, pe_full, block_budget_bytes=10 * 1280)
    )
    assert jnp.allclose(out_tiled, ref, atol=1e-6), "mismatch vs reference (2-D tiled path)"

    # ----- Case 2: d_model % 128 == 0 -> 3-D broadcast path ------------------
    d_model2, seq_len2, batch2 = 128, 16, 2
    pe_full2 = make_positional_encoding(d_model2, max_len)
    x2 = jax.random.normal(k2, (seq_len2, batch2, d_model2), dtype=jnp.float32)
    ref2 = x2 + pe_full2[:seq_len2]

    # ----- Case 3 inputs (built before any kernel touches x2) ----------------
    x3 = x2.astype(jnp.bfloat16)
    ref3 = x3.astype(jnp.float32) + pe_full2[:seq_len2]

    out2 = jax.block_until_ready(positional_encoding_forward(x2, pe_full2))
    assert jnp.allclose(out2, ref2, atol=1e-6), "mismatch vs reference (3-D path)"

    # Mixed precision: bf16 x + f32 pe -> f32 output (torch-style promotion).
    out3 = jax.block_until_ready(positional_encoding_forward(x3, pe_full2))
    assert out3.dtype == jnp.float32
    assert jnp.allclose(out3, ref3, atol=1e-6), "mismatch vs reference (bf16 path)"

    print("KERNEL_OK")
</pallas_src>

<mosaic_0001>
module attributes {stable_mosaic.version = 11 : i64} {
  func.func @_pe_add_2d_kernel(%arg0: i32, %arg1: memref<16x64xf32, #tpu.memory_space<vmem>>, %arg2: memref<16x32xf32, #tpu.memory_space<vmem>>, %arg3: memref<16x64xf32, #tpu.memory_space<vmem>>) attributes {dimension_semantics = [#tpu.dimension_semantics<parallel>], iteration_bounds = array<i64: 2>, scalar_prefetch = 0 : i64, scratch_operands = 0 : i64, tpu.core_type = #tpu.core_type<tc>, window_params = [{transform_indices = @transform_0, window_bounds = array<i64: 16, 64>}, {transform_indices = @transform_1, window_bounds = array<i64: 16, 32>}, {transform_indices = @transform_2, window_bounds = array<i64: 16, 64>}]} {
    %c0 = arith.constant 0 : index
    %c0_0 = arith.constant 0 : index
    %0 = vector.load %arg2[%c0, %c0_0] : memref<16x32xf32, #tpu.memory_space<vmem>>, vector<16x32xf32>
    %1 = tpu.concatenate %0, %0 in 1 : vector<16x32xf32>, vector<16x32xf32> -> vector<16x64xf32>
    %c0_1 = arith.constant 0 : index
    %c0_2 = arith.constant 0 : index
    %2 = vector.load %arg1[%c0_1, %c0_2] : memref<16x64xf32, #tpu.memory_space<vmem>>, vector<16x64xf32>
    %3 = arith.addf %2, %1 : vector<16x64xf32>
    %c0_3 = arith.constant 0 : index
    %c0_4 = arith.constant 0 : index
    %4 = vector.load %arg3[%c0_3, %c0_4] : memref<16x64xf32, #tpu.memory_space<vmem>>, vector<16x64xf32>
    tpu.vector_store %arg3[%c0_3, %c0_4], %3 {strides = array<i32>} : memref<16x64xf32, #tpu.memory_space<vmem>>, vector<16x64xf32>,
    return
  }
  func.func @transform_0(%arg0: i32) -> (i32, i32) {
    %c0_i32 = arith.constant 0 : i32
    %c0_i32_0 = arith.constant 0 : i32
    return %arg0, %c0_i32 : i32, i32
  }
  func.func @transform_1(%arg0: i32) -> (i32, i32) {
    %c0_i32 = arith.constant 0 : i32
    %c0_i32_0 = arith.constant 0 : i32
    return %arg0, %c0_i32 : i32, i32
  }
  func.func @transform_2(%arg0: i32) -> (i32, i32) {
    %c0_i32 = arith.constant 0 : i32
    %c0_i32_0 = arith.constant 0 : i32
    return %arg0, %c0_i32 : i32, i32
  }
}

</mosaic_0001>

<bundles_post_ra>
// kernel: tpu_custom_call.1
= control target key start
LH: loop header
LB: loop body
LE: loop exit
PB: predicated region body
PF: predicated region fallthrough
CT: control target
= control target key end

     0   :  { %7 = vsyncpa [#allocation3], 0  ;;  %s627_s0 = inlined_call_operand.hbm [shape: f32[32,64], index: 0, kind: input, shape index: {}, may-alias: {0,2}]   ;;  %s628_s1 = inlined_call_operand.vmem [shape: f32[32,32], index: 1, kind: input, shape index: {}]   ;;  %s629_s2 = inlined_call_operand.hbm [shape: f32[32,64], index: 2, kind: output, shape index: {}, may-alias: {0,2}]  }
   0x1   :  { %9 = vsyncpa [#allocation3 + $0x1], 0 }
   0x2   :  { %10 = vsyncpa [#allocation4], 0 }
   0x3   :  { %12 = vsyncpa [#allocation4 + $0x1], 0  ;;  %s496_s9 = smov 0   ;;  %s498_s10 = smov 0  }
   0x4   :  { %s500_s11 = smov 0   ;;  %s502_s12 = smov 0  }
   0x5 LB: > { %s517_s13 = sadd.s32 4294967295, %s474_s12   ;;  %s309_s14 = sadd.s32 4294967294, %s474_s12   ;;  %s474_s12 = sphi %s502_s12, %s639_s12   ;;  %s470_s11 = sphi %s500_s11, %s638_s11   ;;  %s466_s10 = sphi %s498_s10, %s637_s10   ;;  %s462_s9 = sphi %s496_s9, %s636_s9  }
   0x6   : > { %s521_s15 = sadd.s32 1, %s474_s12   ;;  %s25_s16 = sadd.s32 1, %s470_s11 }
   0x7   : > { %s22_s17 = ssub.s32 %s474_s12, %s521_s15  ;;  %p32_p0 = scmp.ne.s32.totalorder %s470_s11, %s466_s10 }
   0x8   : > { %p23_p1 = scmp.eq.s32.totalorder %s22_s17, 0  ;;  %p33_p2 = scmp.eq.s32.totalorder %s474_s12, 0 }
   0x9   : > { %p38_p3 = scmp.ne.s32.totalorder %s466_s10, %s462_s9  ;;  %p39_p4 = scmp.eq.s32.totalorder %s517_s13, 0 }
   0xa   : > { %s533_s18 = scalar_select %p23_p1, %s470_s11, %s25_s16  }
   0xb   : > { %p535_p5 = por %p33_p2, %p32_p0  ;;  %p539_p6 = por %p39_p4, %p38_p3 }
   0xc   : > { %p88_p7 = scmp.eq.s32.totalorder %s517_s13, 1  ;;  %p94_p8 = scmp.eq.s32.totalorder %s309_s14, 1 }
   0xd   : > { %p339_p10 = scmp.lt.s32.totalorder %s474_s12, 2  ;;  %s114_s23 = sand.u32 1, %s470_s11  }
   0xe   : > { %p546_p11 = por %p88_p7, %p32_p0  ;;  %p550_p12 = por %p94_p8, %p38_p3 }
   0xf   : > { %s325_s24 = sshll.u32 %s474_s12, 4  ;;  %s312_s25 = sshll.u32 %s114_s23, 4 }
  0x10   : > { %s123_s28 = scalar_lea.hbm %s627_s0, %s325_s24  ;;  %s118_s30 = scalar_lea.vmem [#allocation2], %s312_s25 }
  0x11   : > { %s124_s29 = sshll.u32 %s123_s28, 4  ;;  %s126_s3 = sshll.u32 %s118_s30, 4  ;;  %s125_s29 = int_to_ptr.hbm [resolvable:$true] %s124_s29  ;;  %s127_s3 = int_to_ptr.vmem [resolvable:$true] %s126_s3 }
  0x12   : > { %p561_p13 = pnand %p339_p10, %p535_p5  ;;  %p315_p0 = scmp.ge.s32.totalorder %s474_s12, 1 }
  0x13   : > { %p143_p1 = scmp.lt.s32.totalorder %s474_s12, 3  ;;  %s115_s5 = scalar_lea.sflag [#allocation3], %s114_s23 }
  0x14   : > { %s378_s6 = sshra.s32 %s125_s29, 4  ;;  %p382_p3 = pneg %p561_p13  ;;  %s379_s6 = int_to_ptr.hbm [resolvable:$true] %s378_s6 }
  0x15   : > { %s380_s7 = scalar_lea.hbm %s379_s6, 16  ;;  %s385_s16 = scalar_lea.hbm %s627_s0, 32 }
  0x16   : > { %p381_p2 = scmp.ne.s32.totalorder %s379_s6, %s380_s7  ;;  %p386_p5 = scmp.lt.s32.totalorder %s379_s6, %s627_s0 }
  0x17   : > { %p387_p8 = scmp.lt.s32.totalorder %s385_s16, %s380_s7 }
  0x18   : > { %p383_p4 = pnand %p382_p3, %p381_p2 }
  0x19   : > { %p388_p10 = por %p387_p8, %p386_p5 }
  0x1a   : > { %p384_p7 = pneg %p383_p4 }
  0x1c   : > { %p389_p9 = pnand %p388_p10, %p384_p7 }
  0x1e   : > { %392 = shalt.err (!%p389_p9)
}
  0x1f   : > { %s476_s23 = smov 128   ;;  %s477_s24 = smov 8  }
  0x20   : > { %334 = dma.hbm_to_vmem [thread:$0]  (!%p561_p13), %s125_s29, 256, %s127_s3, %s115_s5, %s476_s23, %s476_s23, %s477_s24  }
  0x21   : > { %p144_p2 = pnand %p315_p0, %p143_p1 }
  0x22   : > { %s582_s25 = sand.u32 (!%p144_p2), 1, %s466_s10  }
  0x23   : > { %147 = sbr.rel (%p144_p2) target bundleno = 178 (0xb2), region = 28  ;;  %s316_s26 = sshll.u32 (!%p144_p2), %s582_s25, 4 }
  0x24   : > { %s150_s27 = scalar_lea.sflag (!%p144_p2), [#allocation3], %s582_s25  ;;  %s153_s28 = scalar_lea.vmem (!%p144_p2), [#allocation2], %s316_s26 }
  0x28   : > { %453 = dma.done.wait (%p539_p6), %s150_s27, 256  }
  0x29   : > { %455 = vsyncadd (%p539_p6), %s150_s27, 4294967040  ;;  %s318_s29 = sshll.u32 %s517_s13, 1  ;;  %s478_s6 = smov 32   ;;  %vm198_vm0 = vcmask 261120   ;;  %v201_v2 = vld [vmem:[%s153_s28] sm:$0xff]  ;;  %vm205_vm1 = vcmask 523264  }
  0x2a   : > { %p182_p9 = scmp.lt.s32.totalorder %s318_s29, 3  ;;  %s326_s20 = sshll.u32 %s517_s13, 4  ;;  %v202_v6 = vld [vmem:[%s153_s28 + $0x8] sm:$0xff] }
  0x2b   : > { %s220_s14 = scalar_lea.hbm %s629_s2, %s326_s20  ;;  %s179_s16 = scalar_lea.vmem [#allocation5], %s316_s26 }
  0x2c   : > { %s641_s29 = smov (!%p182_p9, %s318_s29), 3  ;;  %s221_s17 = sshll.u32 %s179_s16, 4  ;;  %s222_s17 = int_to_ptr.vmem [resolvable:$true] %s221_s17 }
  0x2d   : > { %s319_s30 = sshll.u32 %s641_s29, 3  ;;  %s223_s19 = sshll.u32 %s220_s14, 4  ;;  %s224_s19 = int_to_ptr.hbm [resolvable:$true] %s223_s19 }
  0x2e   : > { %s185_s5 = scalar_lea.vmem %s628_s1, %s319_s30  ;;  %s209_s13 = scalar_lea.sflag [#allocation4], %s582_s25 }
  0x2f   : > { %v188_v0 = vld [vmem:[%s185_s5] sm:$0xff]  ;;  %v189_v1 = vld [vmem:[%s185_s5 + $0x8] sm:$0xff]  ;;  %s422_s23 = sshra.s32 %s224_s19, 4  ;;  %s428_s29 = scalar_lea.hbm %s629_s2, 32  ;;  %s423_s23 = int_to_ptr.hbm [resolvable:$true] %s422_s23 }
  0x30   : > { %192 = vrot.lane.b32.xlu0 %v188_v0, %s478_s6  ;;  %s424_s24 = scalar_lea.hbm %s423_s23, 16  ;;  %p429_p1 = scmp.lt.s32.totalorder %s423_s23, %s629_s2 }
  0x31   : > { %p425_p6 = scmp.ne.s32.totalorder %s423_s23, %s424_s24  ;;  %p430_p3 = scmp.lt.s32.totalorder %s428_s29, %s424_s24 }
  0x33   : > { %p426_p13 = pnand %p425_p6, %p546_p11  ;;  %p431_p4 = por %p430_p3, %p429_p1 }
  0x35   : > { %p427_p0 = pneg %p426_p13 }
  0x37   : > { %p432_p7 = pnand %p431_p4, %p427_p0 }
  0x38   : > { %194 = vrot.lane.b32.xlu0 %v189_v1, %s478_s6 }
  0xa2   : > { %v193_v3 = vpop.permute.xlu0 %192 }
  0xa3   : > { %v199_v4 = vsel %vm198_vm0, %v188_v0, %v193_v3 }
  0xa4   : > { %v203_v5 = vadd.f32 %v201_v2, %v199_v4 }
  0xa6   : > { %206 = vst.msk [vmem:[%s179_s16] sm:$0xff] %vm205_vm1, %v203_v5 }
  0xaa   : > { %v195_v7 = vpop.permute.xlu0 %194 }
  0xab   : > { %v200_v8 = vsel %vm198_vm0, %v189_v1, %v195_v7 }
  0xac   : > { %v204_v9 = vadd.f32 %v202_v6, %v200_v8 }
  0xae   : > { %207 = vst.msk [vmem:[%s179_s16 + $0x8] sm:$0xff] %vm205_vm1, %v204_v9 }
  0xaf   : > { %435 = shalt.err (!%p432_p7)
}
  0xb0   : > { %s479_s25 = smov 128   ;;  %s480_s3 = smov 8  }
  0xb1   : > { %329 = dma.vmem_to_hbm [thread:$0]  (%p546_p11), %s222_s17, 256, %s224_s19, %s209_s13, %s479_s25, %s479_s25, %s480_s3  }
  0xb2 PF: > { %s238_s4 = sand.u32 1, %s462_s9   ;;  %p635_p5 = scmp.ge.s32.totalorder %s474_s12, 2 }
  0xb3   : > { %s239_s5 = scalar_lea.sflag [#allocation4], %s238_s4 }
  0xb4   : > { %p336_p8 = pnand %p635_p5, %p550_p12 }
  0xb6   : > { %p337_p10 = pneg %p336_p8 }
  0xb8   : > { %457 = dma.done.wait (%p337_p10), %s239_s5, 256  }
  0xb9   : > { %459 = vsyncadd (%p337_p10), %s239_s5, 4294967040  ;;  %p15_p2 = scmp.ge.s32.totalorder %s521_s15, 4   ;;  %s636_s9 = smov %s466_s10 }
  0xba   : > { %s637_s10 = smov %s470_s11  ;;  %s638_s11 = smov %s533_s18 }
  0xbb   : > { %s639_s12 = smov %s521_s15  ;;  %17 = sbr.rel (!%p15_p2) target bundleno = 5 (0x5), region = 76 }
  0xc0   :  { %245 = vsyncpa [#allocation3], 1 }
  0xc1   :  { %247 = vsyncpa [#allocation3 + $0x1], 1 }
  0xc2   :  { %248 = vsyncpa [#allocation4], 1 }
  0xc3   :  { %250 = vsyncpa [#allocation4 + $0x1], 1 }

</bundles_post_ra>
